<compile_context>
chip_gen: v7x
topology: tpu7x:2x2x1
jax: 0.10.0
libtpu: 0.0.40
codegen_flags: <defaults>
</compile_context>

<pallas_src>
import jax
import jax.numpy as jnp
from jax import lax
from jax.experimental import pallas as pl
from jax.experimental.pallas import tpu as pltpu

EPS = 1e-5                              # nn.BatchNorm2d default eps
_VMEM_LIMIT = 32 * 1024 * 1024          # explicit scoped-VMEM budget (all gens)
_FUSE_BLOCK_BYTES = 6 * 1024 * 1024     # max per-image (C, HW) f32 block to fuse


# ---------------------------------------------------------------------------
# Fused single-pass kernel: one image per grid step.
# ---------------------------------------------------------------------------
def _fused_arm_kernel(x_ref, w_ref, b_ref, s_ref, t_ref, o_ref):
    x = x_ref[0]                                            # (C, HW)
    hw = x.shape[-1]

    # Global spatial sum: lane-chunked VPU adds first, so only one cross-lane
    # (XLU) reduction of width 128 remains on the critical path.
    n_chunks = hw // 128
    if n_chunks >= 2:
        acc = x[:, :128]
        for j in range(1, n_chunks):
            acc = acc + x[:, j * 128:(j + 1) * 128]
        pooled = jnp.sum(acc, axis=-1, keepdims=True)       # (C, 1)
        if hw % 128:
            pooled = pooled + jnp.sum(x[:, n_chunks * 128:], axis=-1,
                                      keepdims=True)
    else:
        pooled = jnp.sum(x, axis=-1, keepdims=True)         # (C, 1)

    # 1x1 conv on the pooled mean (w already carries the 1/HW avgpool factor),
    # then BN + sigmoid.  (C,C)@(C,1) is negligible FLOPs.
    z = jnp.dot(w_ref[...], pooled, preferred_element_type=jnp.float32)
    z = z + b_ref[...]
    gate = jax.nn.sigmoid(z * s_ref[...] + t_ref[...])      # (C, 1)

    # relu(bn(x * gate)) == relu(x * (gate*s) + t): one FMA per element.
    g = gate * s_ref[...]
    o_ref[0] = jnp.maximum(x * g + t_ref[...], 0.0)


# ---------------------------------------------------------------------------
# Fallback pass 1: lane-wide (C, 128) partial spatial sums per image.
# ---------------------------------------------------------------------------
def _pool_partial_kernel(x_ref, o_ref):
    ti = pl.program_id(1)

    @pl.when(ti == 0)
    def _init():
        o_ref[...] = jnp.zeros_like(o_ref)

    x = x_ref[0]                                            # (C, tile), tile%128==0
    acc = o_ref[0]                                          # (C, 128) resident acc
    for j in range(x.shape[-1] // 128):                     # pure VPU adds
        acc = acc + x[:, j * 128:(j + 1) * 128]
    o_ref[0] = acc


# ---------------------------------------------------------------------------
# Fallback pass 2: out = relu(x * g + t), lane-dense (C, tile) tiles.
# ---------------------------------------------------------------------------
def _apply_kernel(x_ref, g_ref, t_ref, o_ref):
    o_ref[0] = jnp.maximum(x_ref[0] * g_ref[0] + t_ref[...], 0.0)


# ---------------------------------------------------------------------------
# Wrapper: BN folding, path selection, tiling, pallas_calls.
# ---------------------------------------------------------------------------
def _choose_tile(hw, c):
    """Spatial tile (multiple of 128) and padded HW for the two-pass path."""
    budget = 2 * 1024 * 1024                                # x block ~<= 2 MiB
    max_tile = (budget // (4 * c)) // 128 * 128
    hw128 = ((hw + 127) // 128) * 128
    max_tile = max(128, min(2048, max_tile, hw128))
    # Prefer an exact multiple-of-128 divisor of hw (no padding needed).
    for cand in range(max_tile, 127, -128):
        if hw % cand == 0 and (cand >= 256 or max_tile == 128):
            return cand, hw
    # Otherwise pad hw up to a multiple of the largest allowed tile.
    return max_tile, ((hw + max_tile - 1) // max_tile) * max_tile


def attention_refinement_pallas(x, params, *, force_two_pass=False,
                                tile_override=None):
    """out = relu(bn(x * sigmoid(bn(conv1x1(avgpool(x)))))), eval-mode BN."""
    N, C, H, W = x.shape
    HW = H * W
    xf = x.reshape(N, C, HW).astype(jnp.float32)

    # Fold BatchNorm (running stats) into per-channel scale/shift once, in
    # plain JAX (hoisted out of the kernels).
    s_vec = params["gamma"] * lax.rsqrt(params["var"] + EPS)      # (C,)
    t_vec = params["beta"] - params["mean"] * s_vec               # (C,)
    s_col = s_vec.reshape(C, 1)
    t_col = t_vec.reshape(C, 1)

    block_bytes = C * HW * 4
    use_fused = (not force_two_pass and tile_override is None
                 and block_bytes <= _FUSE_BLOCK_BYTES)

    # TODO(synk): on v7x (2 TensorCores/chip) a CORE_PARALLEL grid axis (or
    # pl.core_map) would split the streaming work across both cores; kept on
    # plain "parallel"/"arbitrary" semantics here for portability.
    if use_fused:
        w_scaled = params["w"].astype(jnp.float32) * (1.0 / HW)   # folds avgpool
        b_col = params["b"].reshape(C, 1).astype(jnp.float32)
        out = pl.pallas_call(
            _fused_arm_kernel,
            out_shape=jax.ShapeDtypeStruct((N, C, HW), jnp.float32),
            grid_spec=pltpu.PrefetchScalarGridSpec(
                num_scalar_prefetch=0,
                grid=(N,),
                in_specs=[
                    pl.BlockSpec((1, C, HW), lambda n: (n, 0, 0)),
                    pl.BlockSpec((C, C), lambda n: (0, 0)),
                    pl.BlockSpec((C, 1), lambda n: (0, 0)),
                    pl.BlockSpec((C, 1), lambda n: (0, 0)),
                    pl.BlockSpec((C, 1), lambda n: (0, 0)),
                ],
                out_specs=pl.BlockSpec((1, C, HW), lambda n: (n, 0, 0)),
            ),
            compiler_params=pltpu.CompilerParams(
                dimension_semantics=("parallel",),
                vmem_limit_bytes=_VMEM_LIMIT),
        )(xf, w_scaled, b_col, s_col, t_col)
        return out.reshape(N, C, H, W)

    # ---------------- fallback: two streaming passes ----------------
    if tile_override is not None:
        tile = int(tile_override)
        assert tile % 128 == 0, "tile_override must be a multiple of 128"
        hw_pad = ((HW + tile - 1) // tile) * tile
    else:
        tile, hw_pad = _choose_tile(HW, C)
    n_tiles = hw_pad // tile

    xp = xf if hw_pad == HW else jnp.pad(xf, ((0, 0), (0, 0), (0, hw_pad - HW)))

    # Pass 1: per-image lane-wide partial spatial sums (pure streaming reduce).
    partial = pl.pallas_call(
        _pool_partial_kernel,
        out_shape=jax.ShapeDtypeStruct((N, C, 128), jnp.float32),
        grid_spec=pltpu.PrefetchScalarGridSpec(
            num_scalar_prefetch=0,
            grid=(N, n_tiles),
            in_specs=[pl.BlockSpec((1, C, tile), lambda n, i: (n, 0, i))],
            out_specs=pl.BlockSpec((1, C, 128), lambda n, i: (n, 0, 0)),
        ),
        compiler_params=pltpu.CompilerParams(
            dimension_semantics=("parallel", "arbitrary"),
            vmem_limit_bytes=_VMEM_LIMIT),
    )(xp)

    # Tiny gate math hoisted to plain JAX (negligible FLOPs; keeps w/b/s/t out
    # of the streaming kernel and avoids lane-sparse (C,1) stores).  Zero
    # padding does not perturb the sum; divide by the true HW.
    pooled = partial.sum(axis=-1) * (1.0 / HW)                     # (N, C) mean
    z = pooled @ params["w"].astype(jnp.float32).T + params["b"]   # 1x1 conv
    gate = jax.nn.sigmoid(z * s_vec + t_vec)                       # bn + sigmoid
    g_fold = (gate * s_vec)[:, :, None]                            # (N, C, 1)

    # Pass 2: out = relu(x * g + t), one FMA per element.
    out = pl.pallas_call(
        _apply_kernel,
        out_shape=jax.ShapeDtypeStruct((N, C, hw_pad), jnp.float32),
        grid_spec=pltpu.PrefetchScalarGridSpec(
            num_scalar_prefetch=0,
            grid=(N, n_tiles),
            in_specs=[
                pl.BlockSpec((1, C, tile), lambda n, i: (n, 0, i)),
                pl.BlockSpec((1, C, 1), lambda n, i: (n, 0, 0)),
                pl.BlockSpec((C, 1), lambda n, i: (0, 0)),
            ],
            out_specs=pl.BlockSpec((1, C, tile), lambda n, i: (n, 0, i)),
        ),
        compiler_params=pltpu.CompilerParams(
            dimension_semantics=("parallel", "parallel"),
            vmem_limit_bytes=_VMEM_LIMIT),
    )(xp, g_fold, t_col)

    return out[:, :, :HW].reshape(N, C, H, W)


# ---------------------------------------------------------------------------
# Deterministic parameter init (matches nn.Module shapes) and a pure-JAX
# reference mirroring the torch forward in eval mode.
# ---------------------------------------------------------------------------
def init_params(key, channels):
    ks = jax.random.split(key, 6)
    w = 0.1 * jax.random.normal(ks[0], (channels, channels), jnp.float32)
    b = 0.1 * jax.random.normal(ks[1], (channels,), jnp.float32)
    gamma = 0.5 + jax.random.uniform(ks[2], (channels,), jnp.float32)
    beta = 0.1 * jax.random.normal(ks[3], (channels,), jnp.float32)
    mean = 0.1 * jax.random.normal(ks[4], (channels,), jnp.float32)
    var = 0.5 + jax.random.uniform(ks[5], (channels,), jnp.float32)
    return {"w": w, "b": b, "gamma": gamma, "beta": beta, "mean": mean, "var": var}


def attention_refinement_reference(x, p):
    s = p["gamma"] * lax.rsqrt(p["var"] + EPS)
    t = p["beta"] - p["mean"] * s
    pooled = x.mean(axis=(2, 3))                             # AdaptiveAvgPool2d((1,1))
    z = pooled @ p["w"].T + p["b"]                           # 1x1 conv
    gate = jax.nn.sigmoid(z * s + t)                         # bn + sigmoid
    y = x * gate[:, :, None, None]                           # torch.mul(input, x)
    y = y * s[None, :, None, None] + t[None, :, None, None]  # same bn again
    return jnp.maximum(y, 0.0)                               # relu


if __name__ == "__main__":
    key = jax.random.PRNGKey(0)
    kx1, kx2, kp = jax.random.split(key, 3)

    # AttentionRefinementModule requires in_channels == out_channels for the
    # gate broadcast (torch.mul(input, gate)); small shapes.
    N, C, H, W = 2, 32, 16, 16
    params = init_params(kp, C)

    # 1) Fused single-pass path (per-image block VMEM-resident).
    x1 = jax.random.normal(kx1, (N, C, H, W), jnp.float32)
    out1 = jax.block_until_ready(attention_refinement_pallas(x1, params))
    ref1 = attention_refinement_reference(x1, params)
    assert out1.shape == x1.shape
    assert jnp.allclose(out1, ref1, atol=1e-3, rtol=1e-3), "fused path mismatch"

    # 2) Two-pass fallback (exercises tiled accumulation + HW padding).
    H2, W2 = 40, 28                                          # HW = 1120 (not %128)
    x2 = jax.random.normal(kx2, (N, C, H2, W2), jnp.float32)
    out2 = jax.block_until_ready(
        attention_refinement_pallas(x2, params, force_two_pass=True,
                                    tile_override=256))
    ref2 = attention_refinement_reference(x2, params)
    assert out2.shape == x2.shape
    assert jnp.allclose(out2, ref2, atol=1e-3, rtol=1e-3), "two-pass mismatch"

    print("KERNEL_OK")
</pallas_src>

<mosaic_0001>
module attributes {stable_mosaic.version = 11 : i64} {
  func.func @_fused_arm_kernel(%arg0: i32, %arg1: memref<1x32x256xf32, #tpu.memory_space<vmem>>, %arg2: memref<32x32xf32, #tpu.memory_space<vmem>>, %arg3: memref<32x1xf32, #tpu.memory_space<vmem>>, %arg4: memref<32x1xf32, #tpu.memory_space<vmem>>, %arg5: memref<32x1xf32, #tpu.memory_space<vmem>>, %arg6: memref<1x32x256xf32, #tpu.memory_space<vmem>>) attributes {dimension_semantics = [#tpu.dimension_semantics<parallel>], iteration_bounds = array<i64: 2>, scalar_prefetch = 0 : i64, scratch_operands = 0 : i64, tpu.core_type = #tpu.core_type<tc>, window_params = [{transform_indices = @transform_0, window_bounds = array<i64: 1, 32, 256>}, {pipeline_mode = #tpu.pipeline_mode<synchronous>, transform_indices = @transform_1, window_bounds = array<i64: 32, 32>}, {pipeline_mode = #tpu.pipeline_mode<synchronous>, transform_indices = @transform_2, window_bounds = array<i64: 32, 1>}, {pipeline_mode = #tpu.pipeline_mode<synchronous>, transform_indices = @transform_3, window_bounds = array<i64: 32, 1>}, {pipeline_mode = #tpu.pipeline_mode<synchronous>, transform_indices = @transform_4, window_bounds = array<i64: 32, 1>}, {transform_indices = @transform_5, window_bounds = array<i64: 1, 32, 256>}]} {
    %c0 = arith.constant 0 : index
    %c0_0 = arith.constant 0 : index
    %c0_1 = arith.constant 0 : index
    %0 = vector.load %arg1[%c0, %c0_0, %c0_1] : memref<1x32x256xf32, #tpu.memory_space<vmem>>, vector<1x32x256xf32>
    %1 = vector.shape_cast %0 : vector<1x32x256xf32> to vector<32x256xf32>
    %2 = vector.extract_strided_slice %1 {offsets = [0, 0], sizes = [32, 128], strides = [1, 1]} : vector<32x256xf32> to vector<32x128xf32>
    %3 = vector.extract_strided_slice %1 {offsets = [0, 128], sizes = [32, 128], strides = [1, 1]} : vector<32x256xf32> to vector<32x128xf32>
    %4 = arith.addf %2, %3 : vector<32x128xf32>
    %cst = arith.constant dense<0.000000e+00> : vector<32xf32>
    %5 = vector.multi_reduction <add>, %4, %cst [1] : vector<32x128xf32> to vector<32xf32>
    %6 = vector.shape_cast %5 : vector<32xf32> to vector<32x1xf32>
    %c0_2 = arith.constant 0 : index
    %c0_3 = arith.constant 0 : index
    %7 = vector.load %arg2[%c0_2, %c0_3] : memref<32x32xf32, #tpu.memory_space<vmem>>, vector<32x32xf32>
    %cst_4 = arith.constant dense<0.000000e+00> : vector<32x1xf32>
    %8 = tpu.matmul %7, %6, %cst_4 {dimension_numbers = #tpu.dot_dimension_numbers<[1], [0], [0], [1], [0, 0, 1, 1], [], []>} : vector<32x32xf32>, vector<32x1xf32>, vector<32x1xf32> -> vector<32x1xf32>
    %c0_5 = arith.constant 0 : index
    %c0_6 = arith.constant 0 : index
    %9 = vector.load %arg3[%c0_5, %c0_6] : memref<32x1xf32, #tpu.memory_space<vmem>>, vector<32x1xf32>
    %10 = arith.addf %8, %9 : vector<32x1xf32>
    %c0_7 = arith.constant 0 : index
    %c0_8 = arith.constant 0 : index
    %11 = vector.load %arg4[%c0_7, %c0_8] : memref<32x1xf32, #tpu.memory_space<vmem>>, vector<32x1xf32>
    %12 = arith.mulf %10, %11 : vector<32x1xf32>
    %c0_9 = arith.constant 0 : index
    %c0_10 = arith.constant 0 : index
    %13 = vector.load %arg5[%c0_9, %c0_10] : memref<32x1xf32, #tpu.memory_space<vmem>>, vector<32x1xf32>
    %14 = arith.addf %12, %13 : vector<32x1xf32>
    %15 = arith.negf %14 : vector<32x1xf32>
    %16 = math.exp %15 : vector<32x1xf32>
    %cst_11 = arith.constant 1.000000e+00 : f32
    %17 = vector.broadcast %cst_11 : f32 to vector<32x1xf32>
    %18 = arith.addf %17, %16 : vector<32x1xf32>
    %19 = arith.divf %17, %18 : vector<32x1xf32>
    %c0_12 = arith.constant 0 : index
    %c0_13 = arith.constant 0 : index
    %20 = vector.load %arg4[%c0_12, %c0_13] : memref<32x1xf32, #tpu.memory_space<vmem>>, vector<32x1xf32>
    %21 = arith.mulf %19, %20 : vector<32x1xf32>
    %22 = vector.broadcast %21 : vector<32x1xf32> to vector<32x256xf32>
    %23 = arith.mulf %1, %22 : vector<32x256xf32>
    %c0_14 = arith.constant 0 : index
    %c0_15 = arith.constant 0 : index
    %24 = vector.load %arg5[%c0_14, %c0_15] : memref<32x1xf32, #tpu.memory_space<vmem>>, vector<32x1xf32>
    %25 = vector.broadcast %24 : vector<32x1xf32> to vector<32x256xf32>
    %26 = arith.addf %23, %25 : vector<32x256xf32>
    %cst_16 = arith.constant 0.000000e+00 : f32
    %27 = vector.broadcast %cst_16 : f32 to vector<32x256xf32>
    %28 = arith.maximumf %26, %27 : vector<32x256xf32>
    %c0_17 = arith.constant 0 : index
    %c0_18 = arith.constant 0 : index
    %c0_19 = arith.constant 0 : index
    %29 = vector.load %arg6[%c0_17, %c0_18, %c0_19] : memref<1x32x256xf32, #tpu.memory_space<vmem>>, vector<1x32x256xf32>
    %30 = vector.shape_cast %29 : vector<1x32x256xf32> to vector<32x256xf32>
    %31 = vector.shape_cast %28 : vector<32x256xf32> to vector<1x32x256xf32>
    tpu.vector_store %arg6[%c0_17, %c0_18, %c0_19], %31 {strides = array<i32>} : memref<1x32x256xf32, #tpu.memory_space<vmem>>, vector<1x32x256xf32>,
    return
  }
  func.func @transform_0(%arg0: i32) -> (i32, i32, i32) {
    %c0_i32 = arith.constant 0 : i32
    %c0_i32_0 = arith.constant 0 : i32
    %c0_i32_1 = arith.constant 0 : i32
    return %arg0, %c0_i32, %c0_i32_0 : i32, i32, i32
  }
  func.func @transform_1(%arg0: i32) -> (i32, i32) {
    %c0_i32 = arith.constant 0 : i32
    %c0_i32_0 = arith.constant 0 : i32
    %c0_i32_1 = arith.constant 0 : i32
    return %c0_i32, %c0_i32_0 : i32, i32
  }
  func.func @transform_2(%arg0: i32) -> (i32, i32) {
    %c0_i32 = arith.constant 0 : i32
    %c0_i32_0 = arith.constant 0 : i32
    %c0_i32_1 = arith.constant 0 : i32
    return %c0_i32, %c0_i32_0 : i32, i32
  }
  func.func @transform_3(%arg0: i32) -> (i32, i32) {
    %c0_i32 = arith.constant 0 : i32
    %c0_i32_0 = arith.constant 0 : i32
    %c0_i32_1 = arith.constant 0 : i32
    return %c0_i32, %c0_i32_0 : i32, i32
  }
  func.func @transform_4(%arg0: i32) -> (i32, i32) {
    %c0_i32 = arith.constant 0 : i32
    %c0_i32_0 = arith.constant 0 : i32
    %c0_i32_1 = arith.constant 0 : i32
    return %c0_i32, %c0_i32_0 : i32, i32
  }
  func.func @transform_5(%arg0: i32) -> (i32, i32, i32) {
    %c0_i32 = arith.constant 0 : i32
    %c0_i32_0 = arith.constant 0 : i32
    %c0_i32_1 = arith.constant 0 : i32
    return %arg0, %c0_i32, %c0_i32_0 : i32, i32, i32
  }
}

</mosaic_0001>

<bundles_post_ra>
// kernel: tpu_custom_call.1
= control target key start
LH: loop header
LB: loop body
LE: loop exit
PB: predicated region body
PF: predicated region fallthrough
CT: control target
= control target key end

     0   :  { %10 = vsyncpa [#allocation3], 0  ;;  %s1095_s0 = inlined_call_operand.hbm [shape: f32[2,32,256], index: 0, kind: input, shape index: {}]   ;;  %s1096_s1 = inlined_call_operand.vmem [shape: f32[32,32], index: 1, kind: input, shape index: {}]   ;;  %s1097_s2 = inlined_call_operand.vmem [shape: f32[32,1], index: 2, kind: input, shape index: {}]   ;;  %s1098_s3 = inlined_call_operand.vmem [shape: f32[32,1], index: 3, kind: input, shape index: {}]   ;;  %s1099_s4 = inlined_call_operand.vmem [shape: f32[32,1], index: 4, kind: input, shape index: {}]   ;;  %s1100_s5 = inlined_call_operand.hbm [shape: f32[2,32,256], index: 5, kind: output, shape index: {}]  }
   0x1   :  { %12 = vsyncpa [#allocation3 + $0x1], 0 }
   0x2   :  { %13 = vsyncpa [#allocation4], 0 }
   0x3   :  { %15 = vsyncpa [#allocation4 + $0x1], 0  ;;  %s834_s18 = smov 0   ;;  %s836_s19 = smov 0  }
   0x4   :  { %s838_s20 = smov 0   ;;  %s840_s21 = smov 0  }
   0x5 LB: > { %s855_s22 = sadd.s32 4294967295, %s795_s21   ;;  %s572_s23 = sadd.s32 4294967294, %s795_s21   ;;  %s795_s21 = sphi %s840_s21, %s1113_s21   ;;  %s791_s20 = sphi %s838_s20, %s1112_s20   ;;  %s787_s19 = sphi %s836_s19, %s1111_s19   ;;  %s783_s18 = sphi %s834_s18, %s1110_s18  }
   0x6   : > { %s859_s24 = sadd.s32 1, %s795_s21   ;;  %s28_s25 = sadd.s32 1, %s791_s20 }
   0x7   : > { %s25_s26 = ssub.s32 %s795_s21, %s859_s24  ;;  %p35_p0 = scmp.ne.s32.totalorder %s791_s20, %s787_s19 }
   0x8   : > { %p26_p1 = scmp.eq.s32.totalorder %s25_s26, 0  ;;  %p36_p2 = scmp.eq.s32.totalorder %s795_s21, 0 }
   0x9   : > { %p41_p3 = scmp.ne.s32.totalorder %s787_s19, %s783_s18  ;;  %p42_p4 = scmp.eq.s32.totalorder %s855_s22, 0 }
   0xa   : > { %s871_s27 = scalar_select %p26_p1, %s791_s20, %s28_s25  }
   0xb   : > { %p873_p5 = por %p36_p2, %p35_p0  ;;  %p877_p6 = por %p42_p4, %p41_p3 }
   0xc   : > { %p149_p7 = scmp.eq.s32.totalorder %s855_s22, 1  ;;  %p155_p8 = scmp.eq.s32.totalorder %s572_s23, 1 }
   0xd   : > { %p642_p10 = scmp.lt.s32.totalorder %s795_s21, 2  ;;  %s187_s7 = sand.u32 1, %s791_s20  }
   0xe   : > { %p884_p11 = por %p149_p7, %p35_p0  ;;  %p888_p12 = por %p155_p8, %p41_p3 }
   0xf   : > { %s594_s8 = sshll.u32 %s795_s21, 10  ;;  %s575_s9 = sshll.u32 %s187_s7, 6 }
  0x10   : > { %s1104_s30 = scalar_select %p884_p11, 1, 0 }
  0x11   : > { %s1105_s6 = scalar_select %p888_p12, 1, 0 }
  0x12   : > { %s897_s12 = scalar_lea.hbm %s1095_s0, %s594_s8  ;;  %s191_s13 = scalar_lea.vmem [#allocation2], %s575_s9 }
  0x13   : > { %s198_s14 = sshll.u32 %s191_s13, 4  ;;  %p901_p13 = pnand %p642_p10, %p873_p5  ;;  %s905_s14 = int_to_ptr.vmem [resolvable:$true] %s198_s14 }
  0x14   : > { %s907_s16 = scalar_lea.sflag [#allocation3], %s187_s7  ;;  %s699_s17 = scalar_lea.hbm %s897_s12, 1024 }
  0x15   : > { %p700_p0 = scmp.ne.s32.totalorder %s897_s12, %s699_s17  ;;  %p701_p1 = pneg %p901_p13 }
  0x16   : > { %s704_s26 = scalar_lea.hbm %s1095_s0, 2048  ;;  %p705_p4 = scmp.lt.u32.totalorder %s897_s12, %s1095_s0 }
  0x17   : > { %p702_p2 = pnand %p701_p1, %p700_p0  ;;  %p706_p5 = scmp.lt.u32.totalorder %s704_s26, %s699_s17 }
  0x18   : > { %p708_p8 = scmp.lt.u32.totalorder %s699_s17, %s897_s12 }
  0x19   : > { %p703_p3 = pneg %p702_p2  ;;  %p707_p7 = por %p706_p5, %p705_p4 }
  0x1b   : > { %p709_p10 = por %p708_p8, %p707_p7 }
  0x1d   : > { %p710_p9 = pnand %p709_p10, %p703_p3 }
  0x1f   : > { %713 = shalt.err (!%p710_p9)
}
  0x20   : > { %s714_s7 = scalar_lea.vmem %s905_s14, 1024  ;;  %s797_s9 = smov [#allocation2]  }
  0x21   : > { %p715_p0 = scmp.ne.s32.totalorder %s905_s14, %s714_s7  ;;  %s719_s10 = sshll.u32 %s797_s9, 4  ;;  %s720_s10 = int_to_ptr.vmem [resolvable:$false] %s719_s10 }
  0x22   : > { %s721_s11 = scalar_lea.vmem %s720_s10, 2048  ;;  %p722_p11 = scmp.lt.s32.totalorder %s905_s14, %s720_s10 }
  0x23   : > { %p717_p2 = pnand %p715_p0, %p701_p1  ;;  %p723_p4 = scmp.lt.s32.totalorder %s721_s11, %s714_s7 }
  0x25   : > { %p718_p12 = pneg %p717_p2  ;;  %p724_p5 = por %p723_p4, %p722_p11 }
  0x27   : > { %p725_p7 = pnand %p724_p5, %p718_p12 }
  0x29   : > { %728 = shalt.err (!%p725_p7)
}
  0x2a   : > { %s798_s13 = smov 256   ;;  %s799_s17 = smov 16  }
  0x2b   : > { %637 = dma.hbm_to_vmem [thread:$0]  (!%p901_p13), %s897_s12, 1024, %s905_s14, %s907_s16, %s798_s13, %s798_s13, %s799_s17  }
  0x2c   : > { %p578_p9 = scmp.ge.s32.totalorder %s795_s21, 1  ;;  %p206_p1 = scmp.lt.s32.totalorder %s795_s21, 3 }
  0x2e   : > { %p207_p3 = pnand %p578_p9, %p206_p1 }
  0x2f   : > { %s938_s23 = sand.u32 (!%p207_p3), 1, %s787_s19  }
  0x30   : > { %210 = sbr.rel (%p207_p3) target bundleno = 633 (0x279), region = 40  ;;  %s579_s25 = sshll.u32 (!%p207_p3), %s938_s23, 6 }
  0x31   : > { %s213_s26 = scalar_lea.sflag (!%p207_p3), [#allocation3], %s938_s23  ;;  %s216_s28 = scalar_lea.vmem (!%p207_p3), [#allocation2], %s579_s25 }
  0x37   : > { %774 = dma.done.wait (%p877_p6), %s213_s26, 1024  }
  0x38   : > { %776 = vsyncadd (%p877_p6), %s213_s26, 4294966272  ;;  %v948_v0 = vld [vmem:[%s216_s28 + $0x20] sm:$0xff]  ;;  %v950_v1 = vld [vmem:[%s216_s28 + $0x28] sm:$0xff]  ;;  %vm271_vm0 = vcmask 261120   ;;  %v800_v22 = vmov 0   ;;  %s1030_s16 = scalar_lea.vmem [#allocation5], %s579_s25 }
  0x39   : > { %v952_v2 = vld [vmem:[%s216_s28] sm:$0xff]  ;;  %v253_v3 = vadd.f32 %v950_v1, %v948_v0  ;;  %v956_v4 = vld [vmem:[%s216_s28 + $0x8] sm:$0xff]  ;;  %v958_v5 = vld [vmem:[%s216_s28 + $0x30] sm:$0xff]  ;;  %682 = vset.pattern.permute.xlu1 %v800_v22  ;;  %681 = vset.pattern.permute.xlu0 %v800_v22  ;;  %s499_s25 = sshll.u32 %s1030_s16, 4  ;;  %s595_s8 = sshll.u32 %s855_s22, 10  ;;  %s1042_s25 = int_to_ptr.vmem [resolvable:$true] %s499_s25 }
  0x3a   : > { %v960_v6 = vld [vmem:[%s216_s28 + $0x38] sm:$0xff]  ;;  %v251_v7 = vadd.f32 %v956_v4, %v952_v2  ;;  %v964_v8 = vld [vmem:[%s216_s28 + $0x10] sm:$0xff]  ;;  %v263_v12 = vld [vmem:[%s1096_s1] sm:$0xff]  ;;  %s1047_s10 = scalar_lea.hbm %s1100_s5, %s595_s8  ;;  %s486_s22 = scalar_lea.sflag [#allocation4], %s938_s23 }
  0x3b   : > { %v966_v9 = vld [vmem:[%s216_s28 + $0x18] sm:$0xff]  ;;  %259 = vadd.xlane.f32.xlu1 %v253_v3  ;;  %v254_v10 = vadd.f32 %v960_v6, %v958_v5  ;;  %612 = vmatprep.mubr.msk.f32.mxu0 %vm271_vm0, %v263_v12  ;;  %v265_v13 = vld [vmem:[%s1096_s1 + $0x10] sm:$0xff]  ;;  %v264_v20 = vld [vmem:[%s1096_s1 + $0x8] sm:$0xff]  ;;  %s729_s11 = scalar_lea.vmem %s1042_s25, 1024  ;;  %p1107_p11 = scmp.ne.s32.totalorder %s1104_s30, 0 }
  0x3c   : > { %255 = vadd.xlane.f32.xlu0 %v251_v7  ;;  %v252_v11 = vadd.f32 %v966_v9, %v964_v8  ;;  %615 = vmatprep.mubr.msk.f32.mxu1 %vm271_vm0, %v265_v13  ;;  %v266_v21 = vld [vmem:[%s1096_s1 + $0x18] sm:$0xff]  ;;  %v268_v23 = vld [vmem:[%s1097_s2 + $0x8] sm:$0xff]  ;;  %v267_v25 = vld [vmem:[%s1097_s2] sm:$0xff]  ;;  %p730_p6 = scmp.ne.s32.totalorder %s1042_s25, %s729_s11  ;;  %s801_s13 = smov [#allocation5]  }
  0x3d   : > { %v270_v24 = vld [vmem:[%s1097_s2 + $0x18] sm:$0xff]  ;;  %v370_v27 = vld [vmem:[%s1098_s3 + $0x8] sm:$0xff]  ;;  %v369_v32 = vld [vmem:[%s1098_s3] sm:$0xff]  ;;  %s733_s17 = sshll.u32 %s801_s13, 4  ;;  %s734_s17 = int_to_ptr.vmem [resolvable:$false] %s733_s17 }
  0x3e   : > { %v372_v29 = vld [vmem:[%s1098_s3 + $0x18] sm:$0xff]  ;;  %v378_v35 = vld [vmem:[%s1099_s4 + $0x8] sm:$0xff]  ;;  %v269_v38 = vld [vmem:[%s1097_s2 + $0x10] sm:$0xff]  ;;  %p731_p12 = pnand %p730_p6, %p1107_p11  ;;  %s735_s26 = scalar_lea.vmem %s734_s17, 2048 }
  0x3f   : > { %261 = vadd.xlane.f32.xlu1 %v254_v10  ;;  %v380_v37 = vld [vmem:[%s1099_s4 + $0x18] sm:$0xff]  ;;  %v377_v40 = vld [vmem:[%s1099_s4] sm:$0xff]  ;;  %v371_v47 = vld [vmem:[%s1098_s3 + $0x10] sm:$0xff]  ;;  %p736_p8 = scmp.lt.s32.totalorder %s1042_s25, %s734_s17  ;;  %p737_p10 = scmp.lt.s32.totalorder %s735_s26, %s729_s11 }
  0x40   : > { %257 = vadd.xlane.f32.xlu0 %v252_v11  ;;  %v379_v52 = vld [vmem:[%s1099_s4 + $0x10] sm:$0xff]  ;;  %p732_p13 = pneg %p731_p12 }
  0x41   : > { %p738_p0 = por %p737_p10, %p736_p8 }
  0x43   : > { %p739_p2 = pnand %p738_p0, %p732_p13 }
  0xc8   : > { %v260_v14 = vpop.xlane.xlu1 %259 }
  0xc9   : > { %v256_v15 = vpop.xlane.xlu0 %255 }
  0xcc   : > { %v262_v16 = vpop.xlane.xlu1 %261 }
  0xcd   : > { %v258_v17 = vpop.xlane.xlu0 %257  ;;  %v622_v19 = vpack.c.bf16 %v262_v16, %v260_v14 }
  0xce   : > { %v618_v18 = vpack.c.bf16 %v258_v17, %v256_v15 }
  0xd0   : > { %619 = vmatprep.subr.bf16.mxu0 %v618_v18  ;;  %626 = vmatprep.subr.bf16.mxu1 %v618_v18 }
  0xd1   : > { %621 = vmatpush3.bf16.msra.mxu0 %v618_v18  ;;  %628 = vmatpush3.bf16.msra.mxu1 %v618_v18 }
  0xd2   : > { %623 = vmatprep.subr.bf16.mxu0 %v622_v19  ;;  %627 = vmatprep.subr.bf16.mxu1 %v622_v19 }
  0xd5   : > { %625 = vmatpush3.bf16.msra.mxu0 %v622_v19  ;;  %629 = vmatpush3.bf16.msra.mxu1 %v622_v19 }
  0xd8   : > { %613 = vmatmul.mubr.msk.f32.vlgmr.msra.gmra.mrb[0].mxu0 %vm271_vm0, %v264_v20  ;;  %616 = vmatmul.mubr.msk.f32.vlgmr.msra.gmra.mrb[0].mxu1 %vm271_vm0, %v266_v21 }
 0x1ab   : > { %v614_v26 = vpop.f32.mrb[0].mxu0  ;;  %v617_v28 = vpop.f32.mrb[0].mxu1 }
 0x1ac   : > { %v356_v30 = vadd.f32 %v614_v26, %v268_v23  ;;  %v350_v31 = vpop.f32.mrb[1].mxu0  ;;  %v366_v33 = vadd.f32 %v617_v28, %v270_v24  ;;  %v360_v34 = vpop.f32.mrb[1].mxu1 }
 0x1ad   : > { %v351_v36 = vadd.f32 %v350_v31, %v267_v25  ;;  %v361_v45 = vadd.f32 %v360_v34, %v269_v38 }
 0x1ae   : > { %v374_v39 = vmul.f32 %v370_v27, %v356_v30  ;;  %v376_v41 = vmul.f32 %v372_v29, %v366_v33 }
 0x1af   : > { %v373_v42 = vmul.f32 %v369_v32, %v351_v36  ;;  %v375_v51 = vmul.f32 %v371_v47, %v361_v45 }
 0x1b0   : > { %v382_v43 = vadd.f32 %v378_v35, %v374_v39  ;;  %v384_v44 = vadd.f32 %v380_v37, %v376_v41 }
 0x1b1   : > { %v381_v46 = vadd.f32 %v377_v40, %v373_v42  ;;  %v383_v53 = vadd.f32 %v379_v52, %v375_v51 }
 0x1b2   : > { %v586_v48 = vmul.f32 -1.442695, %v382_v43  ;;  %v588_v49 = vmul.f32 -1.442695, %v384_v44 }
 0x1b3   : > { %v585_v50 = vmul.f32 -1.442695, %v381_v46  ;;  %v587_v54 = vmul.f32 -1.442695, %v383_v53 }
 0x1b4   : > { %683 = vpow2.f32 %v586_v48 }
 0x1b5   : > { %685 = vpow2.f32 %v585_v50 }
 0x1b6   : > { %687 = vpow2.f32 %v588_v49 }
 0x1b7   : > { %689 = vpow2.f32 %v587_v54 }
 0x1be   : > { %v684_v55 = vpop.eup %683 }
 0x1bf   : > { %v686_v56 = vpop.eup %685  ;;  %v398_v57 = vadd.f32 1.0, %v684_v55 }
 0x1c0   : > { %v688_v58 = vpop.eup %687  ;;  %v397_v59 = vadd.f32 1.0, %v686_v56 }
 0x1c1   : > { %691 = vrcp.f32 %v398_v57  ;;  %v400_v60 = vadd.f32 1.0, %v688_v58  ;;  %v690_v61 = vpop.eup %689 }
 0x1c2   : > { %693 = vrcp.f32 %v397_v59  ;;  %v399_v12 = vadd.f32 1.0, %v690_v61 }
 0x1c3   : > { %695 = vrcp.f32 %v400_v60 }
 0x1c4   : > { %697 = vrcp.f32 %v399_v12 }
 0x1cb   : > { %v692_v62 = vpop.eup %691 }
 0x1cc   : > { %v694_v63 = vpop.eup %693  ;;  %v410_v3 = vmul.f32 %v692_v62, %v370_v27 }
 0x1cd   : > { %v696_v7 = vpop.eup %695  ;;  %v409_v10 = vmul.f32 %v694_v63, %v369_v32 }
 0x1ce   : > { %420 = vperm.xlu1 %682, %v410_v3   ;;  %v412_v11 = vmul.f32 %v696_v7, %v372_v29  ;;  %v698_v13 = vpop.eup %697 }
 0x1cf   : > { %415 = vperm.xlu0 %681, %v409_v10   ;;  %v411_v14 = vmul.f32 %v698_v13, %v371_v47 }
 0x1d2   : > { %430 = vperm.xlu1 %682, %v412_v11  }
 0x1d6   : > { %443 = vperm.xlu1 %682, %v377_v40  }
 0x1da   : > { %448 = vperm.xlu1 %682, %v378_v35  }
 0x1de   : > { %453 = vperm.xlu1 %682, %v379_v52  }
 0x1e2   : > { %425 = vperm.xlu1 %682, %v411_v14  }
 0x1e6   : > { %458 = vperm.xlu1 %682, %v380_v37  }
 0x24d   : > { %v421_v15 = vpop.permute.xlu1 %420 }
 0x24e   : > { %v416_v16 = vpop.permute.xlu0 %415  ;;  %v435_v23 = vmul.f32 %v421_v15, %v964_v8  ;;  %v436_v24 = vmul.f32 %v421_v15, %v966_v9 }
 0x24f   : > { %v433_v18 = vmul.f32 %v416_v16, %v952_v2  ;;  %v434_v19 = vmul.f32 %v416_v16, %v956_v4 }
 0x251   : > { %v431_v17 = vpop.permute.xlu1 %430 }
 0x252   : > { %v439_v32 = vmul.f32 %v431_v17, %v958_v5  ;;  %v440_v33 = vmul.f32 %v431_v17, %v960_v6 }
 0x255   : > { %v444_v20 = vpop.permute.xlu1 %443 }
 0x256   : > { %v461_v21 = vadd.f32 %v444_v20, %v433_v18  ;;  %v462_v22 = vadd.f32 %v444_v20, %v434_v19 }
 0x258   : > { %v469_v25 = vmax.f32 %v461_v21, 0.0  ;;  %v470_v26 = vmax.f32 %v462_v22, 0.0 }
 0x259   : > { %v449_v27 = vpop.permute.xlu1 %448 }
 0x25a   : > { %477 = vst [vmem:[%s1030_s16] sm:$0xff] %v469_v25  ;;  %478 = vst [vmem:[%s1030_s16 + $0x8] sm:$0xff] %v470_v26  ;;  %v463_v2 = vadd.f32 %v449_v27, %v435_v23  ;;  %v464_v4 = vadd.f32 %v449_v27, %v436_v24 }
 0x25c   : > { %v471_v28 = vmax.f32 %v463_v2, 0.0  ;;  %v472_v8 = vmax.f32 %v464_v4, 0.0 }
 0x25d   : > { %v454_v29 = vpop.permute.xlu1 %453 }
 0x25e   : > { %479 = vst [vmem:[%s1030_s16 + $0x10] sm:$0xff] %v471_v28  ;;  %480 = vst [vmem:[%s1030_s16 + $0x18] sm:$0xff] %v472_v8 }
 0x261   : > { %v426_v9 = vpop.permute.xlu1 %425 }
 0x262   : > { %v437_v30 = vmul.f32 %v426_v9, %v948_v0  ;;  %v438_v31 = vmul.f32 %v426_v9, %v950_v1 }
 0x264   : > { %v465_v34 = vadd.f32 %v454_v29, %v437_v30  ;;  %v466_v35 = vadd.f32 %v454_v29, %v438_v31 }
 0x265   : > { %v459_v36 = vpop.permute.xlu1 %458 }
 0x266   : > { %v473_v0 = vmax.f32 %v465_v34, 0.0  ;;  %v474_v37 = vmax.f32 %v466_v35, 0.0  ;;  %v467_v1 = vadd.f32 %v459_v36, %v439_v32  ;;  %v468_v38 = vadd.f32 %v459_v36, %v440_v33 }
 0x268   : > { %481 = vst [vmem:[%s1030_s16 + $0x20] sm:$0xff] %v473_v0  ;;  %482 = vst [vmem:[%s1030_s16 + $0x28] sm:$0xff] %v474_v37  ;;  %v475_v5 = vmax.f32 %v467_v1, 0.0  ;;  %v476_v6 = vmax.f32 %v468_v38, 0.0 }
 0x26a   : > { %483 = vst [vmem:[%s1030_s16 + $0x30] sm:$0xff] %v475_v5  ;;  %484 = vst [vmem:[%s1030_s16 + $0x38] sm:$0xff] %v476_v6 }
 0x26b   : > { %742 = shalt.err (!%p739_p2)
}
 0x26c   : > { %s743_s28 = scalar_lea.hbm %s1047_s10, 1024  ;;  %s747_s14 = scalar_lea.hbm %s1100_s5, 2048 }
 0x26d   : > { %p744_p4 = scmp.ne.s32.totalorder %s1047_s10, %s743_s28  ;;  %p748_p9 = scmp.lt.u32.totalorder %s1047_s10, %s1100_s5 }
 0x26e   : > { %p749_p1 = scmp.lt.u32.totalorder %s747_s14, %s743_s28  ;;  %p751_p6 = scmp.lt.u32.totalorder %s743_s28, %s1047_s10 }
 0x26f   : > { %p745_p5 = pnand %p744_p4, %p1107_p11 }
 0x270   : > { %p750_p3 = por %p749_p1, %p748_p9 }
 0x271   : > { %p746_p7 = pneg %p745_p5 }
 0x272   : > { %p752_p12 = por %p751_p6, %p750_p3 }
 0x274   : > { %p753_p13 = pnand %p752_p12, %p746_p7 }
 0x276   : > { %756 = shalt.err (!%p753_p13)
}
 0x277   : > { %s802_s8 = smov 256   ;;  %s803_s7 = smov 16  }
 0x278   : > { %632 = dma.vmem_to_hbm [thread:$0]  (%p1107_p11), %s1042_s25, 1024, %s1047_s10, %s486_s22, %s802_s8, %s802_s8, %s803_s7  }
 0x279 PF: > { %s514_s9 = sand.u32 1, %s783_s18   ;;  %p1108_p8 = scmp.ne.s32.totalorder %s1105_s6, 0 }
 0x27a   : > { %p1109_p10 = scmp.ge.s32.totalorder %s795_s21, 2  ;;  %s515_s11 = scalar_lea.sflag [#allocation4], %s514_s9 }
 0x27c   : > { %p639_p0 = pnand %p1109_p10, %p1108_p8 }
 0x27e   : > { %778 = dma.done.wait (!%p639_p0), %s515_s11, 1024  }
 0x27f   : > { %780 = vsyncadd (!%p639_p0), %s515_s11, 4294966272  ;;  %p18_p2 = scmp.ge.s32.totalorder %s859_s24, 4   ;;  %s1110_s18 = smov %s787_s19 }
 0x280   : > { %s1111_s19 = smov %s791_s20  ;;  %s1112_s20 = smov %s871_s27 }
 0x281   : > { %s1113_s21 = smov %s859_s24  ;;  %20 = sbr.rel (!%p18_p2) target bundleno = 5 (0x5), region = 85 }
 0x288   :  { %520 = vsyncpa [#allocation3], 1 }
 0x289   :  { %522 = vsyncpa [#allocation3 + $0x1], 1 }
 0x28a   :  { %523 = vsyncpa [#allocation4], 1 }
 0x28b   :  { %525 = vsyncpa [#allocation4 + $0x1], 1 }

</bundles_post_ra>
